<compile_context>
chip_gen: v6e
topology: v6e:2x2x1
jax: 0.10.0
libtpu: 0.0.40
codegen_flags: <defaults>
</compile_context>

<pallas_src>
import functools
import math

import jax
import jax.numpy as jnp
from jax.experimental import pallas as pl
from jax.experimental.pallas import tpu as pltpu


def _round_up(x, m):
    return ((x + m - 1) // m) * m


# ----------------------------------------------------------------------------
# Pallas kernel: full MLP forward + log-softmax + action select + logp gather.
# ----------------------------------------------------------------------------
def _policy_kernel(obs_ref, w_ref, b_ref, gumbel_ref, ctrl_ref,
                   act_ref, logp_ref, *, n_layers, act_dim, pad_dim):
    # ctrl (SMEM, int32): [use_fixed, fixed_action]
    use_fixed = ctrl_ref[0]
    fixed_action = ctrl_ref[1]

    # ---- MLP: Tanh hidden activations, Identity output (module defaults) ----
    h = obs_ref[...]                                          # (1, P) f32
    for i in range(n_layers):                                 # static unroll
        h = jnp.dot(h, w_ref[i], preferred_element_type=jnp.float32) + b_ref[i]
        if i < n_layers - 1:
            h = jnp.tanh(h)

    # ---- mask padded logits, stable log-softmax ----
    lane = jax.lax.broadcasted_iota(jnp.int32, (1, pad_dim), 1)
    valid = lane < act_dim
    neg = jnp.float32(-1e30)
    logits = jnp.where(valid, h, neg)                         # (1, P)

    m = jnp.max(logits, axis=-1, keepdims=True)
    lse = m + jnp.log(jnp.sum(jnp.exp(logits - m), axis=-1, keepdims=True))
    logp_all = logits - lse                                   # Categorical log-probs

    # ---- action selection ----
    # sample=True : gumbel_ref holds Gumbel noise -> argmax(logits + g) == sample
    # sample=False: gumbel_ref is zeros          -> argmax(logits) == argmax(probs)
    scores = jnp.where(valid, logits + gumbel_ref[...], neg)
    maxv = jnp.max(scores, axis=-1, keepdims=True)
    big = jnp.int32(2 ** 31 - 1)
    idx = jnp.min(jnp.where(scores == maxv, lane, big), axis=-1, keepdims=True)
    action = jnp.where(use_fixed > 0, fixed_action, idx).astype(jnp.int32)  # (1,1)

    act_ref[...] = action
    # gather log_prob(action) on device (no host-side indexing needed)
    logp_ref[...] = jnp.sum(jnp.where(lane == action, logp_all, 0.0),
                            axis=-1, keepdims=True)


# ----------------------------------------------------------------------------
# Cached pallas_call builder (one Mosaic compile per distinct net shape).
# ----------------------------------------------------------------------------
@functools.lru_cache(maxsize=None)
def _build_forward(n_layers, pad_dim, act_dim):
    vmem = pltpu.MemorySpace.VMEM
    smem = pltpu.MemorySpace.SMEM
    return pl.pallas_call(
        functools.partial(_policy_kernel, n_layers=n_layers,
                          act_dim=act_dim, pad_dim=pad_dim),
        out_shape=(
            jax.ShapeDtypeStruct((1, 1), jnp.int32),    # action index
            jax.ShapeDtypeStruct((1, 1), jnp.float32),  # log_prob(action)
        ),
        in_specs=[
            pl.BlockSpec(memory_space=vmem),            # obs       (1, P)
            pl.BlockSpec(memory_space=vmem),            # W^T slab  (L, P, P)
            pl.BlockSpec(memory_space=vmem),            # bias slab (L, 1, P)
            pl.BlockSpec(memory_space=vmem),            # gumbel    (1, P)
            pl.BlockSpec(memory_space=smem),            # ctrl      (2,) int32
        ],
        out_specs=(
            pl.BlockSpec(memory_space=vmem),
            pl.BlockSpec(memory_space=vmem),
        ),
    )


# ----------------------------------------------------------------------------
# Parameter init (matches MlpPolicy.init_parameters: U(-1/sqrt(size(-1)), +))
#   weight: size(-1) == in_features ; bias: size(-1) == out_features
# ----------------------------------------------------------------------------
def init_mlp_policy_params(sizes, key):
    weights, biases = [], []
    for j in range(len(sizes) - 1):
        d_in, d_out = sizes[j], sizes[j + 1]
        key, kw, kb = jax.random.split(key, 3)
        w_std = 1.0 / math.sqrt(d_in)
        b_std = 1.0 / math.sqrt(d_out)
        weights.append(jax.random.uniform(kw, (d_out, d_in), jnp.float32, -w_std, w_std))
        biases.append(jax.random.uniform(kb, (d_out,), jnp.float32, -b_std, b_std))
    return weights, biases


# ----------------------------------------------------------------------------
# One-time packing: pre-transpose + pad params into aligned f32 slabs.
# ----------------------------------------------------------------------------
def pack_mlp_policy_params(weights, biases):
    sizes = [weights[0].shape[1]] + [w.shape[0] for w in weights]
    n_layers = len(weights)
    pad_dim = _round_up(max(sizes), 128)
    w_slab = jnp.zeros((n_layers, pad_dim, pad_dim), jnp.float32)
    b_slab = jnp.zeros((n_layers, 1, pad_dim), jnp.float32)
    for i, (w, b) in enumerate(zip(weights, biases)):
        d_out, d_in = w.shape
        w_slab = w_slab.at[i, :d_in, :d_out].set(jnp.asarray(w, jnp.float32).T)
        b_slab = b_slab.at[i, 0, :d_out].set(jnp.asarray(b, jnp.float32))
    return {
        "w_slab": w_slab, "b_slab": b_slab,
        "n_layers": n_layers, "pad_dim": pad_dim,
        "obs_dim": sizes[0], "act_dim": sizes[-1],
    }


# ----------------------------------------------------------------------------
# Jitted per-step device path (no host syncs; sample/fixed flags are static).
# ----------------------------------------------------------------------------
@functools.partial(
    jax.jit,
    static_argnames=("sample", "has_fixed", "n_layers", "pad_dim", "obs_dim", "act_dim"))
def _policy_step(obs, w_slab, b_slab, key, fixed_action, *, sample, has_fixed,
                 n_layers, pad_dim, obs_dim, act_dim):
    obs_flat = jnp.reshape(obs, (-1,)).astype(jnp.float32)          # obs.view(-1)
    obs_pad = jnp.zeros((1, pad_dim), jnp.float32).at[0, :obs_dim].set(obs_flat)

    if sample and not has_fixed:
        gumbel = jax.random.gumbel(key, (1, pad_dim), jnp.float32)
    else:
        gumbel = jnp.zeros((1, pad_dim), jnp.float32)

    ctrl = jnp.stack([jnp.int32(1 if has_fixed else 0),
                      jnp.asarray(fixed_action, jnp.int32)])

    fwd = _build_forward(n_layers, pad_dim, act_dim)
    act, logp = fwd(obs_pad, w_slab, b_slab, gumbel, ctrl)
    return act[0, 0], logp[0, 0]


def mlp_policy_forward(obs, packed, key=None, sample=True, fixed_action=None):
    """Mirrors MlpPolicy.forward(obs, sample, fixed_action).

    Returns DEVICE scalars (action int32, log_prob f32) — no per-step host sync.
    Call int(action) / .item() once per rollout if host values are needed.
    """
    if key is None:
        key = jax.random.PRNGKey(0)
    has_fixed = fixed_action is not None
    fa = jnp.asarray(fixed_action if has_fixed else 0, jnp.int32)
    return _policy_step(
        obs, packed["w_slab"], packed["b_slab"], key, fa,
        sample=bool(sample), has_fixed=has_fixed,
        n_layers=packed["n_layers"], pad_dim=packed["pad_dim"],
        obs_dim=packed["obs_dim"], act_dim=packed["act_dim"])


# ----------------------------------------------------------------------------
# Pure-JAX reference for correctness checking.
# ----------------------------------------------------------------------------
def _ref_logits_logp(obs, weights, biases):
    h = jnp.reshape(obs, (-1,)).astype(jnp.float32)
    for i, (w, b) in enumerate(zip(weights, biases)):
        h = h @ jnp.asarray(w, jnp.float32).T + jnp.asarray(b, jnp.float32)
        if i < len(weights) - 1:
            h = jnp.tanh(h)
    logp = h - jax.scipy.special.logsumexp(h)
    return h, logp


if __name__ == "__main__":
    key = jax.random.PRNGKey(0)
    k_obs, k_param, k_sample = jax.random.split(key, 3)

    sizes = [16, 32, 32, 8]                       # [obs_dim, hidden, hidden, act_dim]
    weights, biases = init_mlp_policy_params(sizes, k_param)
    packed = pack_mlp_policy_params(weights, biases)

    obs = jax.random.normal(k_obs, (4, 4), jnp.float32)   # flattened to 16 inside

    # sample=True path (stochastic action via Gumbel-max inside the kernel)
    a_s, lp_s = mlp_policy_forward(obs, packed, key=k_sample, sample=True)
    # sample=False path (greedy action = argmax of probs)
    a_g, lp_g = mlp_policy_forward(obs, packed, sample=False)
    # fixed_action path
    a_f, lp_f = mlp_policy_forward(obs, packed, fixed_action=3)

    jax.block_until_ready((a_s, lp_s, a_g, lp_g, a_f, lp_f))

    # ---- correctness checks against a pure-JAX reference ----
    logits_ref, logp_ref = _ref_logits_logp(obs, weights, biases)
    a_s_i, a_g_i, a_f_i = int(a_s), int(a_g), int(a_f)

    assert 0 <= a_s_i < sizes[-1]
    assert a_g_i == int(jnp.argmax(logits_ref))
    assert a_f_i == 3
    assert bool(jnp.isfinite(lp_s)) and bool(jnp.isfinite(lp_g)) and bool(jnp.isfinite(lp_f))
    assert abs(float(lp_g) - float(logp_ref[a_g_i])) < 1e-4
    assert abs(float(lp_f) - float(logp_ref[3])) < 1e-4
    assert abs(float(lp_s) - float(logp_ref[a_s_i])) < 1e-4

    print("KERNEL_OK")
</pallas_src>

<mosaic_0001>
module attributes {stable_mosaic.version = 11 : i64} {
  func.func @_policy_kernel(%arg0: memref<1x128xf32, #tpu.memory_space<vmem>>, %arg1: memref<3x128x128xf32, #tpu.memory_space<vmem>>, %arg2: memref<3x1x128xf32, #tpu.memory_space<vmem>>, %arg3: memref<1x128xf32, #tpu.memory_space<vmem>>, %arg4: memref<2xi32, #tpu.memory_space<smem>>, %arg5: memref<1x1xi32, #tpu.memory_space<vmem>>, %arg6: memref<1x1xf32, #tpu.memory_space<vmem>>) attributes {dimension_semantics = [], scalar_prefetch = 0 : i64, scratch_operands = 0 : i64, tpu.core_type = #tpu.core_type<tc>} {
    %c0 = arith.constant 0 : index
    %0 = memref.load %arg4[%c0] : memref<2xi32, #tpu.memory_space<smem>>
    %c1 = arith.constant 1 : index
    %1 = memref.load %arg4[%c1] : memref<2xi32, #tpu.memory_space<smem>>
    %c0_0 = arith.constant 0 : index
    %c0_1 = arith.constant 0 : index
    %2 = vector.load %arg0[%c0_0, %c0_1] : memref<1x128xf32, #tpu.memory_space<vmem>>, vector<1x128xf32>
    %c0_2 = arith.constant 0 : index
    %c0_3 = arith.constant 0 : index
    %c0_4 = arith.constant 0 : index
    %3 = vector.load %arg1[%c0_2, %c0_3, %c0_4] : memref<3x128x128xf32, #tpu.memory_space<vmem>>, vector<1x128x128xf32>
    %4 = vector.shape_cast %3 : vector<1x128x128xf32> to vector<128x128xf32>
    %cst = arith.constant dense<0.000000e+00> : vector<1x128xf32>
    %5 = tpu.matmul %2, %4, %cst {dimension_numbers = #tpu.dot_dimension_numbers<[1], [0], [0], [1], [0, 0, 1, 1], [], []>} : vector<1x128xf32>, vector<128x128xf32>, vector<1x128xf32> -> vector<1x128xf32>
    %c0_5 = arith.constant 0 : index
    %c0_6 = arith.constant 0 : index
    %c0_7 = arith.constant 0 : index
    %6 = vector.load %arg2[%c0_5, %c0_6, %c0_7] : memref<3x1x128xf32, #tpu.memory_space<vmem>>, vector<1x1x128xf32>
    %7 = vector.shape_cast %6 : vector<1x1x128xf32> to vector<1x128xf32>
    %8 = arith.addf %5, %7 : vector<1x128xf32>
    %9 = math.tanh %8 : vector<1x128xf32>
    %c1_8 = arith.constant 1 : index
    %c0_9 = arith.constant 0 : index
    %c0_10 = arith.constant 0 : index
    %10 = vector.load %arg1[%c1_8, %c0_9, %c0_10] : memref<3x128x128xf32, #tpu.memory_space<vmem>>, vector<1x128x128xf32>
    %11 = vector.shape_cast %10 : vector<1x128x128xf32> to vector<128x128xf32>
    %cst_11 = arith.constant dense<0.000000e+00> : vector<1x128xf32>
    %12 = tpu.matmul %9, %11, %cst_11 {dimension_numbers = #tpu.dot_dimension_numbers<[1], [0], [0], [1], [0, 0, 1, 1], [], []>} : vector<1x128xf32>, vector<128x128xf32>, vector<1x128xf32> -> vector<1x128xf32>
    %c1_12 = arith.constant 1 : index
    %c0_13 = arith.constant 0 : index
    %c0_14 = arith.constant 0 : index
    %13 = vector.load %arg2[%c1_12, %c0_13, %c0_14] : memref<3x1x128xf32, #tpu.memory_space<vmem>>, vector<1x1x128xf32>
    %14 = vector.shape_cast %13 : vector<1x1x128xf32> to vector<1x128xf32>
    %15 = arith.addf %12, %14 : vector<1x128xf32>
    %16 = math.tanh %15 : vector<1x128xf32>
    %c2 = arith.constant 2 : index
    %c0_15 = arith.constant 0 : index
    %c0_16 = arith.constant 0 : index
    %17 = vector.load %arg1[%c2, %c0_15, %c0_16] : memref<3x128x128xf32, #tpu.memory_space<vmem>>, vector<1x128x128xf32>
    %18 = vector.shape_cast %17 : vector<1x128x128xf32> to vector<128x128xf32>
    %cst_17 = arith.constant dense<0.000000e+00> : vector<1x128xf32>
    %19 = tpu.matmul %16, %18, %cst_17 {dimension_numbers = #tpu.dot_dimension_numbers<[1], [0], [0], [1], [0, 0, 1, 1], [], []>} : vector<1x128xf32>, vector<128x128xf32>, vector<1x128xf32> -> vector<1x128xf32>
    %c2_18 = arith.constant 2 : index
    %c0_19 = arith.constant 0 : index
    %c0_20 = arith.constant 0 : index
    %20 = vector.load %arg2[%c2_18, %c0_19, %c0_20] : memref<3x1x128xf32, #tpu.memory_space<vmem>>, vector<1x1x128xf32>
    %21 = vector.shape_cast %20 : vector<1x1x128xf32> to vector<1x128xf32>
    %22 = arith.addf %19, %21 : vector<1x128xf32>
    %23 = tpu.iota {dimensions = array<i32: 1>} : vector<1x128xi32>
    %c8_i32 = arith.constant 8 : i32
    %24 = vector.broadcast %c8_i32 : i32 to vector<1x128xi32>
    %25 = arith.cmpi slt, %23, %24 : vector<1x128xi32>
    %cst_21 = arith.constant -1.000000e+30 : f32
    %26 = vector.broadcast %cst_21 : f32 to vector<1x128xf32>
    %27 = arith.select %25, %22, %26 : vector<1x128xi1>, vector<1x128xf32>
    %cst_22 = arith.constant dense<0xFF800000> : vector<1xf32>
    %28 = vector.multi_reduction <maximumf>, %27, %cst_22 [1] : vector<1x128xf32> to vector<1xf32>
    %29 = vector.shape_cast %28 : vector<1xf32> to vector<1x1xf32>
    %30 = vector.broadcast %29 : vector<1x1xf32> to vector<1x128xf32>
    %31 = arith.subf %27, %30 : vector<1x128xf32>
    %32 = math.exp %31 : vector<1x128xf32>
    %cst_23 = arith.constant dense<0.000000e+00> : vector<1xf32>
    %33 = vector.multi_reduction <add>, %32, %cst_23 [1] : vector<1x128xf32> to vector<1xf32>
    %34 = vector.shape_cast %33 : vector<1xf32> to vector<1x1xf32>
    %35 = math.log %34 : vector<1x1xf32>
    %36 = arith.addf %29, %35 : vector<1x1xf32>
    %37 = vector.broadcast %36 : vector<1x1xf32> to vector<1x128xf32>
    %38 = arith.subf %27, %37 : vector<1x128xf32>
    %c0_24 = arith.constant 0 : index
    %c0_25 = arith.constant 0 : index
    %39 = vector.load %arg3[%c0_24, %c0_25] : memref<1x128xf32, #tpu.memory_space<vmem>>, vector<1x128xf32>
    %40 = arith.addf %27, %39 : vector<1x128xf32>
    %cst_26 = arith.constant -1.000000e+30 : f32
    %41 = vector.broadcast %cst_26 : f32 to vector<1x128xf32>
    %42 = arith.select %25, %40, %41 : vector<1x128xi1>, vector<1x128xf32>
    %cst_27 = arith.constant dense<0xFF800000> : vector<1xf32>
    %43 = vector.multi_reduction <maximumf>, %42, %cst_27 [1] : vector<1x128xf32> to vector<1xf32>
    %44 = vector.shape_cast %43 : vector<1xf32> to vector<1x1xf32>
    %45 = vector.broadcast %44 : vector<1x1xf32> to vector<1x128xf32>
    %46 = arith.cmpf oeq, %42, %45 : vector<1x128xf32>
    %c2147483647_i32 = arith.constant 2147483647 : i32
    %47 = vector.broadcast %c2147483647_i32 : i32 to vector<1x128xi32>
    %48 = arith.select %46, %23, %47 : vector<1x128xi1>, vector<1x128xi32>
    %cst_28 = arith.constant dense<2147483647> : vector<1xi32>
    %49 = vector.multi_reduction <minsi>, %48, %cst_28 [1] : vector<1x128xi32> to vector<1xi32>
    %50 = vector.shape_cast %49 : vector<1xi32> to vector<1x1xi32>
    %c0_i32 = arith.constant 0 : i32
    %51 = arith.cmpi sgt, %0, %c0_i32 : i32
    %52 = vector.broadcast %1 : i32 to vector<1x1xi32>
    %53 = arith.select %51, %52, %50 : vector<1x1xi32>
    %c0_29 = arith.constant 0 : index
    %c0_30 = arith.constant 0 : index
    %54 = vector.load %arg5[%c0_29, %c0_30] : memref<1x1xi32, #tpu.memory_space<vmem>>, vector<1x1xi32>
    tpu.vector_store %arg5[%c0_29, %c0_30], %53 {strides = array<i32>} : memref<1x1xi32, #tpu.memory_space<vmem>>, vector<1x1xi32>,
    %55 = vector.broadcast %53 : vector<1x1xi32> to vector<1x128xi32>
    %56 = arith.cmpi eq, %23, %55 : vector<1x128xi32>
    %cst_31 = arith.constant 0.000000e+00 : f32
    %57 = vector.broadcast %cst_31 : f32 to vector<1x128xf32>
    %58 = arith.select %56, %38, %57 : vector<1x128xi1>, vector<1x128xf32>
    %cst_32 = arith.constant dense<0.000000e+00> : vector<1xf32>
    %59 = vector.multi_reduction <add>, %58, %cst_32 [1] : vector<1x128xf32> to vector<1xf32>
    %60 = vector.shape_cast %59 : vector<1xf32> to vector<1x1xf32>
    %c0_33 = arith.constant 0 : index
    %c0_34 = arith.constant 0 : index
    %61 = vector.load %arg6[%c0_33, %c0_34] : memref<1x1xf32, #tpu.memory_space<vmem>>, vector<1x1xf32>
    tpu.vector_store %arg6[%c0_33, %c0_34], %60 {strides = array<i32>} : memref<1x1xf32, #tpu.memory_space<vmem>>, vector<1x1xf32>,
    return
  }
}

</mosaic_0001>

<bundles_post_ra>
// kernel: _policy_step.1
= control target key start
LH: loop header
LB: loop body
LE: loop exit
PB: predicated region body
PF: predicated region fallthrough
CT: control target
= control target key end

     0   :  { %12 = vsyncpa [#allocation3], 0  ;;  %s792_s0 = inlined_call_operand.vmem [shape: f32[1,128], index: 0, kind: input, shape index: {}]   ;;  %s793_s1 = inlined_call_operand.hbm [shape: f32[3,128,128], index: 1, kind: input, shape index: {}]   ;;  %s794_s2 = inlined_call_operand.vmem [shape: f32[3,1,128], index: 2, kind: input, shape index: {}]   ;;  %s795_s3 = inlined_call_operand.vmem [shape: f32[1,128], index: 3, kind: input, shape index: {}]   ;;  %s796_s4 = inlined_call_operand.vmem [shape: s32[2], index: 4, kind: input, shape index: {}]   ;;  %s797_s5 = inlined_call_operand.hbm [shape: s32[1,1], index: 5, kind: output, shape index: {0}]   ;;  %s798_s6 = inlined_call_operand.hbm [shape: f32[1,1], index: 6, kind: output, shape index: {1}]  }
   0x1   :  { %13 = vsyncpa [#allocation5], 0 }
   0x2   :  { %14 = vsyncpa [#allocation4], 0 }
   0x3   :  { %15 = vsyncpa [#allocation9], 0  ;;  %s661_s21 = smov [#allocation2]   ;;  %s40_s25 = sshll.u32 %s796_s4, 4  ;;  %s41_s25 = int_to_ptr.vmem [resolvable:$true] %s40_s25 }
   0x4   :  { %s23_s22 = sshll.u32 %s661_s21, 4  ;;  %s24_s22 = int_to_ptr.vmem [resolvable:$true] %s23_s22 }
   0x5   :  { %s589_s26 = scalar_lea.vmem %s24_s22, 6144  ;;  %p594_p1 = scmp.lt.s32.totalorder %s24_s22, %s24_s22 }
   0x6   :  { %p590_p0 = scmp.ne.s32.totalorder %s24_s22, %s589_s26  ;;  %p595_p2 = scmp.lt.s32.totalorder %s589_s26, %s589_s26 }
   0x8   :  { %p596_p3 = por %p595_p2, %p594_p1 }
   0xa   :  { %p597_p4 = pnand %p596_p3, %p590_p0 }
   0xc   :  { %600 = shalt.err (!%p597_p4)
}
   0xd   :  { %s662_s27 = smov 128   ;;  %s663_s28 = smov 8  }
   0xe   :  { %29 = dma.hbm_to_vmem [thread:$0]  %s793_s1, 6144, %s24_s22, [#allocation3], %s662_s27, %s662_s27, %s663_s28  }
   0xf   :  { %s601_s7 = scalar_lea.vmem %s41_s25, 16  ;;  %p606_p6 = scmp.lt.s32.totalorder %s41_s25, %s41_s25 }
  0x10   :  { %p602_p5 = scmp.ne.s32.totalorder %s41_s25, %s601_s7  ;;  %p607_p7 = scmp.lt.s32.totalorder %s601_s7, %s601_s7 }
  0x12   :  { %p608_p8 = por %p607_p7, %p606_p6 }
  0x14   :  { %p609_p9 = pnand %p608_p8, %p602_p5 }
  0x16   :  { %612 = shalt.err (!%p609_p9)
}
  0x17   :  { %s664_s4 = smov [#allocation6]  }
  0x18   :  { %43 = dma.vmem_to_smem %s41_s25, 16, %s664_s4, [#allocation5]  }
  0x19   :  { %653 = dma.done.wait [#allocation3], 6144  }
  0x1a   :  { %654 = vsyncadd [#allocation3], 4294961152 }
  0x1b   :  { %655 = dma.done.wait [#allocation5], 16  }
  0x1c   :  { %656 = vsyncadd [#allocation5], 4294967280 }
  0x1d   :  { %50 = sfence }
  0x1e   :  { %v69_v0 = vld [vmem:[#allocation2 + $0x78] sm:$0xff]  ;;  %v665_v1 = vmov 0.0   ;;  %v68_v2 = vld [vmem:[#allocation2 + $0x70] sm:$0xff]  ;;  %vm666_vm0 = vmmov 0   ;;  %v67_v3 = vld [vmem:[#allocation2 + $0x68] sm:$0xff]  ;;  %v321_v60 = vlaneseq  ;;  %vm325_vm2 = vcmask 1040384  }
  0x1f   :  { %460 = vmatprep.subr.mxu0 %v665_v1  ;;  %492 = vmatprep.mubr.msk.f32.mxu0 %vm666_vm0, %v665_v1  ;;  %v66_v4 = vld [vmem:[#allocation2 + $0x60] sm:$0xff]  ;;  %v158_v5 = vld [vmem:[#allocation2 + $0xf8] sm:$0xff]  ;;  %v157_v6 = vld [vmem:[#allocation2 + $0xf0] sm:$0xff]  ;;  %vm368_vm6 = vcmask 0   ;;  %s667_s17 = smov [#allocation7]  }
  0x20   :  { %461 = vmatpush3.msra.mxu0 %v69_v0  ;;  %495 = vmatprep.subr.mxu1 %v665_v1  ;;  %v65_v7 = vld [vmem:[#allocation2 + $0x58] sm:$0xff]  ;;  %v156_v8 = vld [vmem:[#allocation2 + $0xe8] sm:$0xff]  ;;  %v64_v9 = vld [vmem:[#allocation2 + $0x50] sm:$0xff]  ;;  %v322_v61 = vand.u32 127, %v321_v60  ;;  %s382_s18 = sshll.u32 %s667_s17, 4  ;;  %s383_s18 = int_to_ptr.vmem [resolvable:$true] %s382_s18 }
  0x21   :  { %462 = vmatprep.subr.mxu0 %v665_v1  ;;  %527 = vmatprep.mubr.msk.f32.mxu1 %vm666_vm0, %v665_v1  ;;  %v155_v10 = vld [vmem:[#allocation2 + $0xe0] sm:$0xff]  ;;  %v63_v11 = vld [vmem:[#allocation2 + $0x48] sm:$0xff]  ;;  %v154_v12 = vld [vmem:[#allocation2 + $0xd8] sm:$0xff]  ;;  %s613_s19 = scalar_lea.vmem %s383_s18, 16  ;;  %s617_s20 = scalar_lea.vmem %s383_s18, 32 }
  0x22   :  { %463 = vmatpush3.msra.mxu0 %v68_v2  ;;  %496 = vmatpush3.msra.mxu1 %v158_v5  ;;  %v62_v13 = vld [vmem:[#allocation2 + $0x40] sm:$0xff]  ;;  %v153_v14 = vld [vmem:[#allocation2 + $0xd0] sm:$0xff]  ;;  %v61_v15 = vld [vmem:[#allocation2 + $0x38] sm:$0xff]  ;;  %vm323_vm1 = vcmp.lt.s32.totalorder %v322_v61, 8  ;;  %p614_p11 = scmp.ne.s32.totalorder %s383_s18, %s613_s19  ;;  %p618_p12 = scmp.lt.s32.totalorder %s383_s18, %s383_s18 }
  0x23   :  { %464 = vmatprep.subr.mxu0 %v665_v1  ;;  %497 = vmatprep.subr.mxu1 %v665_v1  ;;  %v152_v16 = vld [vmem:[#allocation2 + $0xc8] sm:$0xff]  ;;  %v60_v17 = vld [vmem:[#allocation2 + $0x30] sm:$0xff]  ;;  %v58_v19 = vld [vmem:[#allocation2 + $0x20] sm:$0xff]  ;;  %p619_p13 = scmp.lt.s32.totalorder %s617_s20, %s613_s19 }
  0x24   :  { %465 = vmatpush3.msra.mxu0 %v67_v3  ;;  %498 = vmatpush3.msra.mxu1 %v157_v6  ;;  %v59_v18 = vld [vmem:[#allocation2 + $0x28] sm:$0xff]  ;;  %v57_v20 = vld [vmem:[#allocation2 + $0x18] sm:$0xff]  ;;  %v56_v21 = vld [vmem:[#allocation2 + $0x10] sm:$0xff] }
  0x25   :  { %466 = vmatprep.subr.mxu0 %v665_v1  ;;  %499 = vmatprep.subr.mxu1 %v665_v1  ;;  %v55_v22 = vld [vmem:[#allocation2 + $0x8] sm:$0xff]  ;;  %v54_v23 = vld [vmem:[#allocation2] sm:$0xff]  ;;  %v150_v26 = vld [vmem:[#allocation2 + $0xb8] sm:$0xff]  ;;  %p620_p0 = por %p619_p13, %p618_p12 }
  0x26   :  { %467 = vmatpush3.msra.mxu0 %v66_v4  ;;  %500 = vmatpush3.msra.mxu1 %v156_v8  ;;  %v53_v24 = vld [vmem:[%s792_s0] sm:$0x1]  ;;  %v149_v27 = vld [vmem:[#allocation2 + $0xb0] sm:$0xff]  ;;  %v148_v28 = vld [vmem:[#allocation2 + $0xa8] sm:$0xff] }
  0x27   :  { %468 = vmatprep.subr.mxu0 %v665_v1  ;;  %501 = vmatprep.subr.mxu1 %v665_v1  ;;  %v151_v25 = vld [vmem:[#allocation2 + $0xc0] sm:$0xff]  ;;  %v146_v30 = vld [vmem:[#allocation2 + $0x98] sm:$0xff]  ;;  %v145_v31 = vld [vmem:[#allocation2 + $0x90] sm:$0xff]  ;;  %p621_p1 = pnand %p620_p0, %p614_p11 }
  0x28   :  { %469 = vmatpush3.msra.mxu0 %v65_v7  ;;  %502 = vmatpush3.msra.mxu1 %v155_v10  ;;  %v147_v29 = vld [vmem:[#allocation2 + $0xa0] sm:$0xff]  ;;  %v144_v32 = vld [vmem:[#allocation2 + $0x88] sm:$0xff]  ;;  %v248_v34 = vld [vmem:[#allocation2 + $0x178] sm:$0xff] }
  0x29   :  { %470 = vmatprep.subr.mxu0 %v665_v1  ;;  %503 = vmatprep.subr.mxu1 %v665_v1  ;;  %v143_v33 = vld [vmem:[#allocation2 + $0x80] sm:$0xff]  ;;  %v247_v35 = vld [vmem:[#allocation2 + $0x170] sm:$0xff]  ;;  %v246_v36 = vld [vmem:[#allocation2 + $0x168] sm:$0xff] }
  0x2a   :  { %471 = vmatpush3.msra.mxu0 %v64_v9  ;;  %504 = vmatpush3.msra.mxu1 %v154_v12  ;;  %v245_v37 = vld [vmem:[#allocation2 + $0x160] sm:$0xff]  ;;  %v244_v38 = vld [vmem:[#allocation2 + $0x158] sm:$0xff]  ;;  %v243_v39 = vld [vmem:[#allocation2 + $0x150] sm:$0xff] }
  0x2b   :  { %472 = vmatprep.subr.mxu0 %v665_v1  ;;  %505 = vmatprep.subr.mxu1 %v665_v1  ;;  %v242_v40 = vld [vmem:[#allocation2 + $0x148] sm:$0xff]  ;;  %v70_v41 = vld [vmem:[%s794_s2] sm:$0x1]  ;;  %v240_v47 = vld [vmem:[#allocation2 + $0x138] sm:$0xff] }
  0x2c   :  { %473 = vmatpush3.msra.mxu0 %v63_v11  ;;  %506 = vmatpush3.msra.mxu1 %v153_v14  ;;  %v241_v46 = vld [vmem:[#allocation2 + $0x140] sm:$0xff]  ;;  %v239_v48 = vld [vmem:[#allocation2 + $0x130] sm:$0xff]  ;;  %v238_v49 = vld [vmem:[#allocation2 + $0x128] sm:$0xff] }
  0x2d   :  { %474 = vmatprep.subr.mxu0 %v665_v1  ;;  %507 = vmatprep.subr.mxu1 %v665_v1  ;;  %v237_v50 = vld [vmem:[#allocation2 + $0x120] sm:$0xff]  ;;  %v236_v51 = vld [vmem:[#allocation2 + $0x118] sm:$0xff]  ;;  %v235_v52 = vld [vmem:[#allocation2 + $0x110] sm:$0xff] }
  0x2e   :  { %475 = vmatpush3.msra.mxu0 %v62_v13  ;;  %508 = vmatpush3.msra.mxu1 %v152_v16  ;;  %v234_v53 = vld [vmem:[#allocation2 + $0x108] sm:$0xff]  ;;  %v233_v54 = vld [vmem:[#allocation2 + $0x100] sm:$0xff] }
  0x2f   :  { %476 = vmatprep.subr.mxu0 %v665_v1  ;;  %509 = vmatprep.subr.mxu1 %v665_v1  ;;  %v407_v55 = vld [vmem:[%s794_s2 + $0x1] sm:$0x1]  ;;  %v408_v62 = vld [vmem:[%s794_s2 + $0x2] sm:$0x1]  ;;  %s51_s2 = sld [smem:[#allocation6]] }
  0x30   :  { %477 = vmatpush3.msra.mxu0 %v61_v15  ;;  %510 = vmatpush3.msra.mxu1 %v151_v25 }
  0x31   :  { %478 = vmatprep.subr.mxu0 %v665_v1  ;;  %511 = vmatprep.subr.mxu1 %v665_v1 }
  0x32   :  { %479 = vmatpush3.msra.mxu0 %v60_v17  ;;  %512 = vmatpush3.msra.mxu1 %v150_v26 }
  0x33   :  { %480 = vmatprep.subr.mxu0 %v665_v1  ;;  %513 = vmatprep.subr.mxu1 %v665_v1 }
  0x34   :  { %481 = vmatpush3.msra.mxu0 %v59_v18  ;;  %514 = vmatpush3.msra.mxu1 %v149_v27 }
  0x35   :  { %482 = vmatprep.subr.mxu0 %v665_v1  ;;  %515 = vmatprep.subr.mxu1 %v665_v1  ;;  %p362_p10 = scmp.gt.s32.totalorder %s51_s2, 0 }
  0x36   :  { %483 = vmatpush3.msra.mxu0 %v58_v19  ;;  %516 = vmatpush3.msra.mxu1 %v148_v28 }
  0x37   :  { %484 = vmatprep.subr.mxu0 %v665_v1  ;;  %517 = vmatprep.subr.mxu1 %v665_v1  ;;  %s364_s16 = scalar_select %p362_p10, 1, 0 }
  0x38   :  { %485 = vmatpush3.msra.mxu0 %v57_v20  ;;  %518 = vmatpush3.msra.mxu1 %v147_v29 }
  0x39   :  { %486 = vmatprep.subr.mxu0 %v665_v1  ;;  %519 = vmatprep.subr.mxu1 %v665_v1  ;;  %v365_v26 = vstv %s364_s16 }
  0x3a   :  { %487 = vmatpush3.msra.mxu0 %v56_v21  ;;  %520 = vmatpush3.msra.mxu1 %v146_v30  ;;  %vm366_vm5 = vcmp.eq.s32.totalorder %v365_v26, 1 }
  0x3b   :  { %488 = vmatprep.subr.mxu0 %v665_v1  ;;  %521 = vmatprep.subr.mxu1 %v665_v1 }
  0x3c   :  { %489 = vmatpush3.msra.mxu0 %v55_v22  ;;  %522 = vmatpush3.msra.mxu1 %v145_v31 }
  0x3d   :  { %490 = vmatprep.subr.mxu0 %v665_v1  ;;  %523 = vmatprep.subr.mxu1 %v665_v1 }
  0x3e   :  { %491 = vmatpush3.msra.mxu0 %v54_v23  ;;  %524 = vmatpush3.msra.mxu1 %v144_v32 }
  0x3f   :  { %493 = vmatmul.mubr.f32.vlgmr.msra.gmra.mxu0 %v53_v24  ;;  %530 = vmatprep.subr.mxu0 %v665_v1 }
  0x40   :  { %562 = vmatprep.mubr.msk.f32.mxu0 %vm666_vm0, %v665_v1  ;;  %525 = vmatprep.subr.mxu1 %v665_v1 }
  0x41   :  { %526 = vmatpush3.msra.mxu1 %v143_v33  ;;  %531 = vmatpush3.msra.mxu0 %v248_v34 }
  0x42   :  { %532 = vmatprep.subr.mxu0 %v665_v1 }
  0x43   :  { %533 = vmatpush3.msra.mxu0 %v247_v35 }
  0x44   :  { %534 = vmatprep.subr.mxu0 %v665_v1 }
  0x45   :  { %535 = vmatpush3.msra.mxu0 %v246_v36 }
  0x46   :  { %536 = vmatprep.subr.mxu0 %v665_v1 }
  0x47   :  { %537 = vmatpush3.msra.mxu0 %v245_v37 }
  0x48   :  { %538 = vmatprep.subr.mxu0 %v665_v1 }
  0x49   :  { %539 = vmatpush3.msra.mxu0 %v244_v38 }
  0x4a   :  { %540 = vmatprep.subr.mxu0 %v665_v1 }
  0x4b   :  { %541 = vmatpush3.msra.mxu0 %v243_v39 }
  0x4c   :  { %542 = vmatprep.subr.mxu0 %v665_v1 }
  0x4d   :  { %543 = vmatpush3.msra.mxu0 %v242_v40 }
  0x4e   :  { %544 = vmatprep.subr.mxu0 %v665_v1 }
  0x4f   :  { %545 = vmatpush3.msra.mxu0 %v241_v46 }
  0x50   :  { %546 = vmatprep.subr.mxu0 %v665_v1 }
  0x51   :  { %547 = vmatpush3.msra.mxu0 %v240_v47 }
  0x52   :  { %548 = vmatprep.subr.mxu0 %v665_v1 }
  0x53   :  { %549 = vmatpush3.msra.mxu0 %v239_v48 }
  0x54   :  { %550 = vmatprep.subr.mxu0 %v665_v1 }
  0x55   :  { %551 = vmatpush3.msra.mxu0 %v238_v49 }
  0x56   :  { %552 = vmatprep.subr.mxu0 %v665_v1 }
  0x57   :  { %553 = vmatpush3.msra.mxu0 %v237_v50 }
  0x58   :  { %554 = vmatprep.subr.mxu0 %v665_v1 }
  0x59   :  { %555 = vmatpush3.msra.mxu0 %v236_v51 }
  0x5a   :  { %556 = vmatprep.subr.mxu0 %v665_v1 }
  0x5b   :  { %557 = vmatpush3.msra.mxu0 %v235_v52 }
  0x5c   :  { %558 = vmatprep.subr.mxu0 %v665_v1 }
  0x5d   :  { %559 = vmatpush3.msra.mxu0 %v234_v53 }
  0x5e   :  { %560 = vmatprep.subr.mxu0 %v665_v1  ;;  %v339_v1 = vld [vmem:[%s795_s3] sm:$0x1]  ;;  %s406_s3 = sld [smem:[#allocation6 + $0x1]] }
  0x5f   :  { %561 = vmatpush3.msra.mxu0 %v233_v54 }
  0x64   :  { %v363_v31 = vstv %s406_s3 }
  0xff   :  { %v137_v42 = vpop.f32.mrf.mxu0 }
 0x100   :  { %v138_v43 = vadd.f32 %v137_v42, %v70_v41 }
 0x101   :  { %v494_v44 = vpop.f32.mrf.mxu0 }
 0x102   :  { %573 = vtanh.f32 %v138_v43 }
 0x10f   :  { %v574_v45 = vpop.eup %573 }
 0x110   :  { %528 = vmatmul.mubr.f32.vlgmr.msra.gmra.mxu1 %v574_v45 }
 0x1d0   :  { %v227_v56 = vpop.f32.mrf.mxu1 }
 0x1d1   :  { %v228_v57 = vadd.f32 %v407_v55, %v227_v56 }
 0x1d2   :  { %v529_v58 = vpop.f32.mrf.mxu1 }
 0x1d3   :  { %575 = vtanh.f32 %v228_v57 }
 0x1e0   :  { %v576_v59 = vpop.eup %575 }
 0x1e1   :  { %563 = vmatmul.mubr.f32.vlgmr.msra.gmra.mxu0 %v576_v59 }
 0x2a1   :  { %v317_v63 = vpop.f32.mrf.mxu0 }
 0x2a2   :  { %v318_v0 = vadd.f32 %v408_v62, %v317_v63 }
 0x2a3   :  { %v564_v2 = vpop.f32.mrf.mxu0 }
 0x2a4   :  { %v324_v3 = vsel %vm323_vm1, %v318_v0, -1e+30 }
 0x2a5   :  { %v340_v4 = vadd.f32 %v339_v1, %v324_v3  ;;  %v326_v7 = vsel %vm325_vm2, %v324_v3, -inf }
 0x2a7   :  { %v341_v5 = vsel %vm323_vm1, %v340_v4, -1e+30 }
 0x2a8   :  { %v342_v6 = vsel %vm325_vm2, %v341_v5, -inf }
 0x2a9   :  { %343 = vmax.xlane.f32.xlu0 %v342_v6 }
 0x2ad   :  { %327 = vmax.xlane.f32.xlu0 %v326_v7 }
 0x332   :  { %v344_v8 = vpop.xlane.xlu0 %343 }
 0x333   :  { %vm345_vm3 = vcmp.eq.f32.partialorder %v341_v5, %v344_v8 }
 0x334   :  { %v346_v9 = vsel %vm345_vm3, %v322_v61, 2147483647 }
 0x335   :  { %v347_v10 = vsel %vm325_vm2, %v346_v9, 2147483647 }
 0x336   :  { %v328_v11 = vpop.xlane.xlu0 %327  ;;  %v349_v12 = vshra.s32 %v347_v10, 16  ;;  %v348_v18 = vand.u32 65535, %v347_v10 }
 0x337   :  { %v329_v13 = vsub.f32 %v324_v3, %v328_v11 }
 0x338   :  { %v351_v14 = vcvt.s32.f32 %v349_v12  ;;  %v350_v20 = vcvt.s32.f32 %v348_v18 }
 0x339   :  { %v330_v15 = vmul.f32 1.442695, %v329_v13 }
 0x33a   :  { %352 = vmin.xlane.f32.xlu1 %v351_v14 }
 0x33b   :  { %577 = vpow2.f32 %v330_v15 }
 0x348   :  { %v578_v16 = vpop.eup %577 }
 0x349   :  { %v332_v17 = vsel %vm325_vm2, %v578_v16, 0.0 }
 0x34a   :  { %333 = vadd.xlane.f32.xlu1 %v332_v17 }
 0x3c3   :  { %v353_v19 = vpop.xlane.xlu1 %352 }
 0x3c4   :  { %vm354_vm4 = vcmp.eq.f32.partialorder %v351_v14, %v353_v19  ;;  %v359_v24 = vcvt.f32.s32 %v353_v19 }
 0x3c5   :  { %v355_v21 = vsel %vm354_vm4, %v350_v20, inf }
 0x3c6   :  { %356 = vmin.xlane.f32.xlu0 %v355_v21  ;;  %v360_v28 = vshll.u32 %v359_v24, 16 }
 0x3d3   :  { %v334_v22 = vpop.xlane.xlu1 %333 }
 0x3d4   :  { %579 = vlog2.f32 %v334_v22 }
 0x3e1   :  { %v580_v23 = vpop.eup %579 }
 0x3e2   :  { %v336_v25 = vmul.f32 0.6931472, %v580_v23 }
 0x3e4   :  { %v337_v30 = vadd.f32 %v336_v25, %v328_v11 }
 0x3e6   :  { %v338_v33 = vsub.f32 %v324_v3, %v337_v30 }
 0x44f   :  { %v357_v27 = vpop.xlane.xlu0 %356 }
 0x450   :  { %v358_v29 = vcvt.f32.s32 %v357_v27 }
 0x452   :  { %v361_v32 = vadd.s32 %v360_v28, %v358_v29 }
 0x454   :  { %v367_v34 = vsel %vm366_vm5, %v363_v31, %v361_v32 }
 0x455   :  { %vm370_vm7 = vcmp.eq.s32.totalorder %v322_v61, %v367_v34  ;;  %369 = vst.msk [vmem:[#allocation7] sm:$0x1] %vm368_vm6, %v367_v34 }
 0x456   :  { %v371_v35 = vsel %vm370_vm7, %v338_v33, 0.0 }
 0x457   :  { %v372_v36 = vsel %vm325_vm2, %v371_v35, 0.0 }
 0x458   :  { %373 = vadd.xlane.f32.xlu1 %v372_v36 }
 0x459   :  { %624 = shalt.err (!%p621_p1)
}
 0x45a   :  { %385 = dma.vmem_to_hbm [thread:$0]  %s383_s18, 16, %s797_s5, [#allocation4]  }
 0x45b   :  { %s668_s23 = smov [#allocation8]  }
 0x45c   :  { %s392_s24 = sshll.u32 %s668_s23, 4  ;;  %s393_s24 = int_to_ptr.vmem [resolvable:$true] %s392_s24 }
 0x45d   :  { %s633_s25 = scalar_lea.vmem %s393_s24, 16  ;;  %s637_s26 = scalar_lea.vmem %s393_s24, 32 }
 0x45e   :  { %p634_p2 = scmp.ne.s32.totalorder %s393_s24, %s633_s25  ;;  %p638_p3 = scmp.lt.s32.totalorder %s393_s24, %s393_s24 }
 0x45f   :  { %p639_p4 = scmp.lt.s32.totalorder %s637_s26, %s633_s25 }
 0x461   :  { %p640_p5 = por %p639_p4, %p638_p3 }
 0x463   :  { %p641_p6 = pnand %p640_p5, %p634_p2 }
 0x4e1   :  { %v374_v37 = vpop.xlane.xlu1 %373 }
 0x4e2   :  { %375 = vst.msk [vmem:[#allocation8] sm:$0x1] %vm368_vm6, %v374_v37 }
 0x4e3   :  { %644 = shalt.err (!%p641_p6)
}
 0x4e4   :  { %395 = dma.vmem_to_hbm [thread:$0]  %s393_s24, 16, %s798_s6, [#allocation9]  }
 0x4e5   :  { %657 = dma.done.wait [#allocation4], 16  }
 0x4e6   :  { %658 = vsyncadd [#allocation4], 4294967280 }
 0x4e7   :  { %659 = dma.done.wait [#allocation9], 16  }
 0x4e8   :  { %660 = vsyncadd [#allocation9], 4294967280 }
 0x4e9   :  { %402 = vsyncpa [#allocation3], 1 }
 0x4ea   :  { %403 = vsyncpa [#allocation4], 1 }
 0x4eb   :  { %404 = vsyncpa [#allocation9], 1 }
 0x4ec   :  { %405 = vsyncpa [#allocation5], 1 }

</bundles_post_ra>
